<compile_context>
chip_gen: v7x
topology: tpu7x:2x2x1
jax: 0.10.0
libtpu: 0.0.40
codegen_flags: <defaults>
</compile_context>

<pallas_src>
import math

import jax
import jax.numpy as jnp
from jax.experimental import pallas as pl
from jax.experimental.pallas import tpu as pltpu


def _make_neural_cf_kernel(num_extra_hidden: int):
    """Kernel for one batch tile.  All activations are (features, TB): batch on lanes."""

    def kernel(*refs):
        x_ref, w1_ref, b1_ref = refs[0], refs[1], refs[2]
        idx = 3
        extra = []
        for _ in range(num_extra_hidden):
            extra.append((refs[idx], refs[idx + 1]))
            idx += 2
        wo_ref, bo_ref = refs[idx], refs[idx + 1]
        out_ref = refs[idx + 2]

        f32 = jnp.float32
        bf16 = jnp.bfloat16

        # Fused first hidden layer: single K=128 bf16 MXU matmul, f32 accumulation.
        h = jnp.dot(w1_ref[...], x_ref[...], preferred_element_type=f32) + b1_ref[...]
        h = jnp.maximum(h, 0.0)

        # Remaining hidden layers (dropout is identity in eval mode).
        for w_ref, b_ref in extra:
            h = jnp.dot(w_ref[...], h.astype(bf16),
                        preferred_element_type=f32) + b_ref[...]
            h = jnp.maximum(h, 0.0)

        # Output head: VPU multiply + sublane reduction -> lane-dense (1, TB) store.
        out_ref[...] = jnp.sum(h * wo_ref[...], axis=0, keepdims=True) + bo_ref[...]

    return kernel


def _neural_cf_forward(gene_idx, disease_idx, gene_feat, disease_feat, params):
    """Pallas-backed NeuralCF forward.  Returns (B,) float32 scores."""
    f32 = jnp.float32
    bf16 = jnp.bfloat16
    B = gene_idx.shape[0]

    # Batch tile (lanes).  Big tiles amortize the ~0.35 us/step overhead; keep >= 2
    # tiles when B allows so the parallel axis can shard across v7x's two TCs.
    TB = 128
    while TB < 4096 and TB * 2 <= B:
        TB *= 2
    B_pad = ((B + TB - 1) // TB) * TB
    num_tiles = B_pad // TB

    k = params["gene_emb"].shape[1]
    d_g = gene_feat.shape[1]
    d_d = disease_feat.shape[1]
    F = 2 * k + d_g + d_d
    F_pad = ((F + 127) // 128) * 128

    assert len(params["hidden"]) >= 1, "NeuralCF kernel expects >= 1 hidden layer"

    # ---- Fold the side-feature projections into hidden[0] (exact algebra). ----
    wg, bg = params["gene_fc"]            # (k, d_g), (k,)
    wd, bd = params["disease_fc"]         # (k, d_d), (k,)
    w1, b1 = params["hidden"][0]          # (h1, 4k), (h1,)
    w1g, w1d = w1[:, 0:k], w1[:, k:2 * k]
    w1sg, w1sd = w1[:, 2 * k:3 * k], w1[:, 3 * k:4 * k]
    w1sg_eff = jnp.dot(w1sg, wg)          # (h1, d_g)
    w1sd_eff = jnp.dot(w1sd, wd)          # (h1, d_d)
    b1_eff = b1 + jnp.dot(w1sg, bg) + jnp.dot(w1sd, bd)
    w_eff = jnp.concatenate([w1g, w1d, w1sg_eff, w1sd_eff], axis=1)  # (h1, F)
    w_eff = jnp.pad(w_eff, ((0, 0), (0, F_pad - F))).astype(bf16)    # (h1, F_pad)

    # ---- One fused gather + concat + bf16 cast + pad + transpose pass. ----
    g_e = jnp.take(params["gene_emb"], gene_idx, axis=0)
    d_e = jnp.take(params["disease_emb"], disease_idx, axis=0)
    x_rows = jnp.concatenate(
        [g_e, d_e, gene_feat, disease_feat], axis=1).astype(bf16)    # (B, F)
    x_cols = jnp.zeros((F_pad, B_pad), bf16).at[:F, :B].set(x_rows.T)

    inputs = [x_cols, w_eff, b1_eff.reshape(-1, 1).astype(f32)]
    for w, b in params["hidden"][1:]:
        inputs.extend([w.astype(bf16), b.reshape(-1, 1).astype(f32)])
    wo, bo = params["output"]
    inputs.extend([wo.reshape(-1, 1).astype(f32),   # (h_L, 1) head weights (VPU path)
                   bo.reshape(1, 1).astype(f32)])   # (1, 1) head bias

    # Activation tile streams over the grid; everything else is resident in VMEM
    # (constant index_map -> no re-DMA between grid steps).
    in_specs = [pl.BlockSpec((F_pad, TB), lambda i: (0, i))]
    in_specs += [pl.BlockSpec(a.shape, lambda i: (0, 0)) for a in inputs[1:]]

    kernel = _make_neural_cf_kernel(len(params["hidden"]) - 1)

    out = pl.pallas_call(
        kernel,
        out_shape=jax.ShapeDtypeStruct((1, B_pad), f32),
        grid=(num_tiles,),
        in_specs=in_specs,
        out_specs=pl.BlockSpec((1, TB), lambda i: (0, i)),
        compiler_params=pltpu.CompilerParams(
            dimension_semantics=("parallel",),  # shard batch tiles across TCs (v7x)
        ),
    )(*inputs)

    return out[0, :B]


neural_cf_forward = jax.jit(_neural_cf_forward)


# ----------------------------- parameter init ------------------------------


def xavier_uniform(key, fan_out, fan_in):
    bound = math.sqrt(6.0 / (fan_in + fan_out))
    return jax.random.uniform(
        key, (fan_out, fan_in), minval=-bound, maxval=bound, dtype=jnp.float32
    )


def init_params(key, num_genes, num_diseases, embedding_dim, gene_feat_dim,
                disease_feat_dim, hidden_dims):
    keys = jax.random.split(key, 5 + len(hidden_dims))
    params = {}
    params["gene_emb"] = 0.01 * jax.random.normal(
        keys[0], (num_genes, embedding_dim), dtype=jnp.float32)
    params["disease_emb"] = 0.01 * jax.random.normal(
        keys[1], (num_diseases, embedding_dim), dtype=jnp.float32)
    params["gene_fc"] = (
        xavier_uniform(keys[2], embedding_dim, gene_feat_dim),
        jnp.zeros((embedding_dim,), jnp.float32),
    )
    params["disease_fc"] = (
        xavier_uniform(keys[3], embedding_dim, disease_feat_dim),
        jnp.zeros((embedding_dim,), jnp.float32),
    )
    hidden = []
    input_dim = embedding_dim * 4
    for i, h in enumerate(hidden_dims):
        hidden.append(
            (xavier_uniform(keys[4 + i], h, input_dim), jnp.zeros((h,), jnp.float32)))
        input_dim = h
    params["hidden"] = hidden
    params["output"] = (
        xavier_uniform(keys[4 + len(hidden_dims)], 1, input_dim),
        jnp.zeros((1,), jnp.float32),
    )
    return params


# --------------------------------- main ------------------------------------

if __name__ == "__main__":
    num_genes = 100
    num_diseases = 50
    embedding_dim = 32
    gene_feat_dim = 16
    disease_feat_dim = 24
    hidden_dims = [64, 32]
    B = 8

    key = jax.random.PRNGKey(0)
    pkey, k1, k2, k3, k4 = jax.random.split(key, 5)

    params = init_params(
        pkey, num_genes, num_diseases, embedding_dim,
        gene_feat_dim, disease_feat_dim, hidden_dims,
    )

    gene_idx = jax.random.randint(k1, (B,), 0, num_genes, dtype=jnp.int32)
    disease_idx = jax.random.randint(k2, (B,), 0, num_diseases, dtype=jnp.int32)
    gene_feat = jax.random.normal(k3, (B, gene_feat_dim), dtype=jnp.float32)
    disease_feat = jax.random.normal(k4, (B, disease_feat_dim), dtype=jnp.float32)

    scores = neural_cf_forward(gene_idx, disease_idx, gene_feat, disease_feat, params)
    scores = jax.block_until_ready(scores)

    # Pure f32 reference matching the PyTorch module semantics (eval mode).
    def ref_forward():
        g_e = params["gene_emb"][gene_idx]
        d_e = params["disease_emb"][disease_idx]
        wg, bg_ = params["gene_fc"]
        wd, bd_ = params["disease_fc"]
        s_g = gene_feat @ wg.T + bg_
        s_d = disease_feat @ wd.T + bd_
        h = jnp.concatenate([g_e, d_e, s_g, s_d], axis=-1)
        for w, b in params["hidden"]:
            h = jnp.maximum(h @ w.T + b, 0.0)
        wo, bo_ = params["output"]
        return h @ wo[0] + bo_[0]

    ref = jax.block_until_ready(ref_forward())
    assert scores.shape == (B,)
    # bf16 weights + the exact wrapper-side fold deviate from pure f32 by at most a
    # few bf16 rounding steps; keep a tolerance consistent with that.
    assert jnp.allclose(scores, ref, atol=3e-2, rtol=3e-2), (scores, ref)

    print("KERNEL_OK")
</pallas_src>

<mosaic_0001>
module attributes {stable_mosaic.version = 11 : i64} {
  func.func @kernel(%arg0: i32, %arg1: memref<128x128xbf16, #tpu.memory_space<vmem>>, %arg2: memref<64x128xbf16, #tpu.memory_space<vmem>>, %arg3: memref<64x1xf32, #tpu.memory_space<vmem>>, %arg4: memref<32x64xbf16, #tpu.memory_space<vmem>>, %arg5: memref<32x1xf32, #tpu.memory_space<vmem>>, %arg6: memref<32x1xf32, #tpu.memory_space<vmem>>, %arg7: memref<1x1xf32, #tpu.memory_space<vmem>>, %arg8: memref<1x128xf32, #tpu.memory_space<vmem>>) attributes {dimension_semantics = [#tpu.dimension_semantics<parallel>], iteration_bounds = array<i64: 1>, scalar_prefetch = 0 : i64, scratch_operands = 0 : i64, tpu.core_type = #tpu.core_type<tc>, window_params = [{transform_indices = @transform_0, window_bounds = array<i64: 128, 128>}, {pipeline_mode = #tpu.pipeline_mode<synchronous>, transform_indices = @transform_1, window_bounds = array<i64: 64, 128>}, {pipeline_mode = #tpu.pipeline_mode<synchronous>, transform_indices = @transform_2, window_bounds = array<i64: 64, 1>}, {pipeline_mode = #tpu.pipeline_mode<synchronous>, transform_indices = @transform_3, window_bounds = array<i64: 32, 64>}, {pipeline_mode = #tpu.pipeline_mode<synchronous>, transform_indices = @transform_4, window_bounds = array<i64: 32, 1>}, {pipeline_mode = #tpu.pipeline_mode<synchronous>, transform_indices = @transform_5, window_bounds = array<i64: 32, 1>}, {pipeline_mode = #tpu.pipeline_mode<synchronous>, transform_indices = @transform_6, window_bounds = array<i64: 1, 1>}, {transform_indices = @transform_7, window_bounds = array<i64: 1, 128>}]} {
    %c0 = arith.constant 0 : index
    %c0_0 = arith.constant 0 : index
    %0 = vector.load %arg2[%c0, %c0_0] : memref<64x128xbf16, #tpu.memory_space<vmem>>, vector<64x128xbf16>
    %c0_1 = arith.constant 0 : index
    %c0_2 = arith.constant 0 : index
    %1 = vector.load %arg1[%c0_1, %c0_2] : memref<128x128xbf16, #tpu.memory_space<vmem>>, vector<128x128xbf16>
    %cst = arith.constant dense<0.000000e+00> : vector<64x128xf32>
    %2 = tpu.matmul %0, %1, %cst {dimension_numbers = #tpu.dot_dimension_numbers<[1], [0], [0], [1], [0, 0, 1, 1], [], []>} : vector<64x128xbf16>, vector<128x128xbf16>, vector<64x128xf32> -> vector<64x128xf32>
    %c0_3 = arith.constant 0 : index
    %c0_4 = arith.constant 0 : index
    %3 = vector.load %arg3[%c0_3, %c0_4] : memref<64x1xf32, #tpu.memory_space<vmem>>, vector<64x1xf32>
    %4 = vector.broadcast %3 : vector<64x1xf32> to vector<64x128xf32>
    %5 = arith.addf %2, %4 : vector<64x128xf32>
    %cst_5 = arith.constant 0.000000e+00 : f32
    %6 = vector.broadcast %cst_5 : f32 to vector<64x128xf32>
    %7 = arith.maximumf %5, %6 : vector<64x128xf32>
    %c0_6 = arith.constant 0 : index
    %c0_7 = arith.constant 0 : index
    %8 = vector.load %arg4[%c0_6, %c0_7] : memref<32x64xbf16, #tpu.memory_space<vmem>>, vector<32x64xbf16>
    %9 = arith.truncf %7 : vector<64x128xf32> to vector<64x128xbf16>
    %cst_8 = arith.constant dense<0.000000e+00> : vector<32x128xf32>
    %10 = tpu.matmul %8, %9, %cst_8 {dimension_numbers = #tpu.dot_dimension_numbers<[1], [0], [0], [1], [0, 0, 1, 1], [], []>} : vector<32x64xbf16>, vector<64x128xbf16>, vector<32x128xf32> -> vector<32x128xf32>
    %c0_9 = arith.constant 0 : index
    %c0_10 = arith.constant 0 : index
    %11 = vector.load %arg5[%c0_9, %c0_10] : memref<32x1xf32, #tpu.memory_space<vmem>>, vector<32x1xf32>
    %12 = vector.broadcast %11 : vector<32x1xf32> to vector<32x128xf32>
    %13 = arith.addf %10, %12 : vector<32x128xf32>
    %cst_11 = arith.constant 0.000000e+00 : f32
    %14 = vector.broadcast %cst_11 : f32 to vector<32x128xf32>
    %15 = arith.maximumf %13, %14 : vector<32x128xf32>
    %c0_12 = arith.constant 0 : index
    %c0_13 = arith.constant 0 : index
    %16 = vector.load %arg6[%c0_12, %c0_13] : memref<32x1xf32, #tpu.memory_space<vmem>>, vector<32x1xf32>
    %17 = vector.broadcast %16 : vector<32x1xf32> to vector<32x128xf32>
    %18 = arith.mulf %15, %17 : vector<32x128xf32>
    %cst_14 = arith.constant dense<0.000000e+00> : vector<128xf32>
    %19 = vector.multi_reduction <add>, %18, %cst_14 [0] : vector<32x128xf32> to vector<128xf32>
    %20 = vector.shape_cast %19 : vector<128xf32> to vector<1x128xf32>
    %c0_15 = arith.constant 0 : index
    %c0_16 = arith.constant 0 : index
    %21 = vector.load %arg7[%c0_15, %c0_16] : memref<1x1xf32, #tpu.memory_space<vmem>>, vector<1x1xf32>
    %22 = vector.broadcast %21 : vector<1x1xf32> to vector<1x128xf32>
    %23 = arith.addf %20, %22 : vector<1x128xf32>
    %c0_17 = arith.constant 0 : index
    %c0_18 = arith.constant 0 : index
    %24 = vector.load %arg8[%c0_17, %c0_18] : memref<1x128xf32, #tpu.memory_space<vmem>>, vector<1x128xf32>
    tpu.vector_store %arg8[%c0_17, %c0_18], %23 {strides = array<i32>} : memref<1x128xf32, #tpu.memory_space<vmem>>, vector<1x128xf32>,
    return
  }
  func.func @transform_0(%arg0: i32) -> (i32, i32) {
    %c0_i32 = arith.constant 0 : i32
    %c0_i32_0 = arith.constant 0 : i32
    return %c0_i32, %arg0 : i32, i32
  }
  func.func @transform_1(%arg0: i32) -> (i32, i32) {
    %c0_i32 = arith.constant 0 : i32
    %c0_i32_0 = arith.constant 0 : i32
    %c0_i32_1 = arith.constant 0 : i32
    return %c0_i32, %c0_i32_0 : i32, i32
  }
  func.func @transform_2(%arg0: i32) -> (i32, i32) {
    %c0_i32 = arith.constant 0 : i32
    %c0_i32_0 = arith.constant 0 : i32
    %c0_i32_1 = arith.constant 0 : i32
    return %c0_i32, %c0_i32_0 : i32, i32
  }
  func.func @transform_3(%arg0: i32) -> (i32, i32) {
    %c0_i32 = arith.constant 0 : i32
    %c0_i32_0 = arith.constant 0 : i32
    %c0_i32_1 = arith.constant 0 : i32
    return %c0_i32, %c0_i32_0 : i32, i32
  }
  func.func @transform_4(%arg0: i32) -> (i32, i32) {
    %c0_i32 = arith.constant 0 : i32
    %c0_i32_0 = arith.constant 0 : i32
    %c0_i32_1 = arith.constant 0 : i32
    return %c0_i32, %c0_i32_0 : i32, i32
  }
  func.func @transform_5(%arg0: i32) -> (i32, i32) {
    %c0_i32 = arith.constant 0 : i32
    %c0_i32_0 = arith.constant 0 : i32
    %c0_i32_1 = arith.constant 0 : i32
    return %c0_i32, %c0_i32_0 : i32, i32
  }
  func.func @transform_6(%arg0: i32) -> (i32, i32) {
    %c0_i32 = arith.constant 0 : i32
    %c0_i32_0 = arith.constant 0 : i32
    %c0_i32_1 = arith.constant 0 : i32
    return %c0_i32, %c0_i32_0 : i32, i32
  }
  func.func @transform_7(%arg0: i32) -> (i32, i32) {
    %c0_i32 = arith.constant 0 : i32
    %c0_i32_0 = arith.constant 0 : i32
    return %c0_i32, %arg0 : i32, i32
  }
}

</mosaic_0001>

<bundles_post_ra>
// kernel: _neural_cf_forward.1
= control target key start
LH: loop header
LB: loop body
LE: loop exit
PB: predicated region body
PF: predicated region fallthrough
CT: control target
= control target key end

     0   :  { %v488_v1 = vmov 0   ;;  %vm288_vm0 = vcmask 523264   ;;  %s627_s0 = inlined_call_operand.vmem [shape: bf16[128,128], index: 0, kind: input, shape index: {}]   ;;  %s628_s6 = inlined_call_operand.<no memory space> [shape: f32[1,1], index: 6, kind: input, shape index: {}]   ;;  %s629_s1 = inlined_call_operand.vmem [shape: bf16[64,128], index: 1, kind: input, shape index: {}]   ;;  %s630_s2 = inlined_call_operand.vmem [shape: f32[64,1], index: 2, kind: input, shape index: {}]   ;;  %s631_s4 = inlined_call_operand.vmem [shape: f32[32,1], index: 4, kind: input, shape index: {}]   ;;  %s632_s5 = inlined_call_operand.vmem [shape: f32[32,1], index: 5, kind: input, shape index: {}]   ;;  %s633_s3 = inlined_call_operand.vmem [shape: bf16[32,64], index: 3, kind: input, shape index: {}]   ;;  %s634_s7 = inlined_call_operand.vmem [shape: f32[1,128], index: 7, kind: output, shape index: {}]  }
   0x1   :  { %v474_v0 = vld [vmem:[%s627_s0] sm:$0xff]   ;;  %472 = vset.pattern.permute.xlu0 %v488_v1  ;;  %473 = vset.pattern.permute.xlu1 %v488_v1  ;;  %v12_v2 = vstv %s628_s6  ;;  %v475_v3 = vld [vmem:[%s627_s0 + $0x8] sm:$0xff]   ;;  %v476_v4 = vld [vmem:[%s627_s0 + $0x10] sm:$0xff]  }
   0x2   :  { %13 = vst [vmem:[#allocation2] sm:$0x1] %v12_v2  ;;  %435 = vmatprep.subr.bf16.mxu0 %v474_v0  ;;  %v477_v5 = vld [vmem:[%s627_s0 + $0x18] sm:$0xff]   ;;  %v482_v6 = vld [vmem:[%s629_s1] sm:$0xff]   ;;  %v55_v9 = vld [vmem:[%s630_s2 + $0x10] sm:$0xff] }
   0x3   :  { %436 = vmatpush3.bf16.msra.mxu0 %v474_v0  ;;  %451 = vmatprep.mubr.bf16.mxu0 %v482_v6  ;;  %v478_v7 = vld [vmem:[%s627_s0 + $0x20] sm:$0xff]   ;;  %v54_v10 = vld [vmem:[%s630_s2 + $0x8] sm:$0xff]  ;;  %v56_v11 = vld [vmem:[%s630_s2 + $0x18] sm:$0xff] }
   0x4   :  { %437 = vmatprep.subr.bf16.mxu0 %v475_v3  ;;  %v53_v8 = vld [vmem:[%s630_s2] sm:$0xff]  ;;  %73 = vperm.xlu1 %473, %v55_v9   ;;  %v479_v12 = vld [vmem:[%s627_s0 + $0x28] sm:$0xff]   ;;  %v480_v15 = vld [vmem:[%s627_s0 + $0x30] sm:$0xff]  }
   0x5   :  { %63 = vperm.xlu0 %472, %v53_v8   ;;  %v57_v13 = vld [vmem:[%s630_s2 + $0x20] sm:$0xff]  ;;  %v58_v14 = vld [vmem:[%s630_s2 + $0x28] sm:$0xff]  ;;  %v59_v16 = vld [vmem:[%s630_s2 + $0x30] sm:$0xff] }
   0x6   :  { %v60_v17 = vld [vmem:[%s630_s2 + $0x38] sm:$0xff]  ;;  %v254_v19 = vld [vmem:[%s631_s4] sm:$0xff]  ;;  %v255_v20 = vld [vmem:[%s631_s4 + $0x8] sm:$0xff] }
   0x7   :  { %438 = vmatpush3.bf16.msra.mxu0 %v475_v3  ;;  %v481_v18 = vld [vmem:[%s627_s0 + $0x38] sm:$0xff]   ;;  %v483_v21 = vld [vmem:[%s629_s1 + $0x8] sm:$0xff]   ;;  %v256_v22 = vld [vmem:[%s631_s4 + $0x10] sm:$0xff] }
   0x8   :  { %439 = vmatprep.subr.bf16.mxu0 %v476_v4  ;;  %78 = vperm.xlu1 %473, %v56_v11   ;;  %v257_v23 = vld [vmem:[%s631_s4 + $0x18] sm:$0xff]  ;;  %v484_v24 = vld [vmem:[%s629_s1 + $0x10] sm:$0xff]   ;;  %v348_v25 = vld [vmem:[%s632_s5] sm:$0xff] }
   0x9   :  { %68 = vperm.xlu0 %472, %v54_v10   ;;  %v349_v26 = vld [vmem:[%s632_s5 + $0x8] sm:$0xff]  ;;  %v485_v27 = vld [vmem:[%s629_s1 + $0x18] sm:$0xff]   ;;  %v350_v28 = vld [vmem:[%s632_s5 + $0x10] sm:$0xff] }
   0xa   :  { %v351_v29 = vld [vmem:[%s632_s5 + $0x18] sm:$0xff]  ;;  %v385_v30 = vld [vmem:[#allocation2] sm:$0x1] }
   0xb   :  { %440 = vmatpush3.bf16.msra.mxu0 %v476_v4  ;;  %v486_v31 = vld [vmem:[%s633_s3] sm:$0xff]   ;;  %v487_v4 = vld [vmem:[%s633_s3 + $0x8] sm:$0xff]  }
   0xc   :  { %441 = vmatprep.subr.bf16.mxu0 %v477_v5  ;;  %88 = vperm.xlu1 %473, %v58_v14  }
   0xd   :  { %83 = vperm.xlu0 %472, %v57_v13   ;;  %467 = vmatprep.mubr.msk.bf16.mxu1 %vm288_vm0, %v486_v31  ;;  %v391_v31 = vlaneseq }
   0xf   :  { %442 = vmatpush3.bf16.msra.mxu0 %v477_v5 }
  0x10   :  { %443 = vmatprep.subr.bf16.mxu0 %v478_v7  ;;  %98 = vperm.xlu1 %473, %v60_v17  }
  0x11   :  { %93 = vperm.xlu0 %472, %v59_v16  }
  0x13   :  { %444 = vmatpush3.bf16.msra.mxu0 %v478_v7 }
  0x14   :  { %445 = vmatprep.subr.bf16.mxu0 %v479_v12  ;;  %265 = vperm.xlu1 %473, %v255_v20  }
  0x15   :  { %260 = vperm.xlu0 %472, %v254_v19  }
  0x17   :  { %446 = vmatpush3.bf16.msra.mxu0 %v479_v12 }
  0x18   :  { %447 = vmatprep.subr.bf16.mxu0 %v480_v15  ;;  %275 = vperm.xlu1 %473, %v257_v23  }
  0x19   :  { %270 = vperm.xlu0 %472, %v256_v22  }
  0x1b   :  { %448 = vmatpush3.bf16.msra.mxu0 %v480_v15 }
  0x1c   :  { %449 = vmatprep.subr.bf16.mxu0 %v481_v18  ;;  %359 = vperm.xlu1 %473, %v349_v26  }
  0x1d   :  { %354 = vperm.xlu0 %472, %v348_v25  }
  0x1f   :  { %450 = vmatpush3.bf16.msra.mxu0 %v481_v18 }
  0x20   :  { %369 = vperm.xlu1 %473, %v351_v29  }
  0x21   :  { %364 = vperm.xlu0 %472, %v350_v28  }
  0x22   :  { %452 = vmatmul.mubr.bf16.vlgmr.msra.gmra.mrb[0].mxu0 %v483_v21 }
  0x23   :  { %455 = vmatprep.mubr.bf16.mxu0 %v484_v24 }
  0x25   :  { %388 = vperm.xlu0 %472, %v385_v30  }
  0x2a   :  { %456 = vmatmul.mubr.bf16.gmra.mrb[4].mxu0 %v485_v27 }
  0x83   :  { %v74_v33 = vpop.permute.xlu1 %73 }
  0x84   :  { %v64_v32 = vpop.permute.xlu0 %63 }
  0x87   :  { %v79_v35 = vpop.permute.xlu1 %78 }
  0x88   :  { %v69_v34 = vpop.permute.xlu0 %68 }
  0x8b   :  { %v89_v44 = vpop.permute.xlu1 %88 }
  0x8c   :  { %v84_v39 = vpop.permute.xlu0 %83 }
  0x8f   :  { %v99_v56 = vpop.permute.xlu1 %98 }
  0x90   :  { %v94_v51 = vpop.permute.xlu0 %93 }
  0x93   :  { %v266_v6 = vpop.permute.xlu1 %265 }
  0x94   :  { %v261_v5 = vpop.permute.xlu0 %260 }
  0x97   :  { %v276_v8 = vpop.permute.xlu1 %275 }
  0x98   :  { %v271_v7 = vpop.permute.xlu0 %270 }
  0x9b   :  { %v360_v19 = vpop.permute.xlu1 %359 }
  0x9c   :  { %v355_v14 = vpop.permute.xlu0 %354 }
  0x9f   :  { %v370_v28 = vpop.permute.xlu1 %369 }
  0xa0   :  { %v365_v25 = vpop.permute.xlu0 %364 }
  0xf5   :  { %v453_v36 = vpop.f32.mrb[0].mxu0 }
  0xf6   :  { %v216_v37 = vadd.f32 %v453_v36, %v74_v33  ;;  %v207_v38 = vpop.f32.mrb[1].mxu0 }
  0xf7   :  { %v208_v40 = vadd.f32 %v207_v38, %v64_v32  ;;  %v454_v41 = vpop.f32.mrb[2].mxu0 }
  0xf8   :  { %v219_v42 = vadd.f32 %v454_v41, %v79_v35  ;;  %v210_v43 = vpop.f32.mrb[3].mxu0  ;;  %v240_v46 = vmax.f32 %v216_v37, 0.0 }
  0xf9   :  { %v211_v45 = vadd.f32 %v210_v43, %v69_v34  ;;  %v238_v48 = vmax.f32 %v208_v40, 0.0  ;;  %v392_v34 = vshrl.u32 %v391_v31, 7 }
  0xfa   :  { %v241_v47 = vmax.f32 %v219_v42, 0.0 }
  0xfb   :  { %v239_v49 = vmax.f32 %v211_v45, 0.0  ;;  %v393_v37 = vsub.s32 0, %v392_v34 }
  0xfc   :  { %v251_v50 = vpack.c.bf16 %v241_v47, %v240_v46 }
  0xfd   :  { %v457_v52 = vpop.f32.mrb[4].mxu0  ;;  %v250_v53 = vpack.c.bf16 %v239_v49, %v238_v48 }
  0xfe   :  { %v232_v54 = vadd.f32 %v457_v52, %v94_v51  ;;  %v223_v55 = vpop.f32.mrb[5].mxu0 }
  0xff   :  { %v224_v57 = vadd.f32 %v223_v55, %v84_v39  ;;  %v458_v58 = vpop.f32.mrb[6].mxu0  ;;  %459 = vmatprep.subr.bf16.mxu1 %v250_v53  ;;  %v389_v39 = vpop.permute.xlu0 %388 }
 0x100   :  { %v235_v59 = vadd.f32 %v458_v58, %v99_v56  ;;  %v226_v60 = vpop.f32.mrb[7].mxu0  ;;  %460 = vmatpush3.bf16.msra.mxu1 %v250_v53  ;;  %v244_v62 = vmax.f32 %v232_v54, 0.0  ;;  %v394_v41 = vrot.slane %v389_v39, %v393_v37 }
 0x101   :  { %v227_v61 = vadd.f32 %v226_v60, %v89_v44  ;;  %461 = vmatprep.subr.bf16.mxu1 %v251_v50  ;;  %v242_v0 = vmax.f32 %v224_v57, 0.0 }
 0x102   :  { %v245_v63 = vmax.f32 %v235_v59, 0.0 }
 0x103   :  { %v243_v1 = vmax.f32 %v227_v61, 0.0 }
 0x104   :  { %v253_v2 = vpack.c.bf16 %v245_v63, %v244_v62  ;;  %462 = vmatpush3.bf16.msra.mxu1 %v251_v50 }
 0x105   :  { %v252_v3 = vpack.c.bf16 %v243_v1, %v242_v0 }
 0x107   :  { %463 = vmatprep.subr.bf16.mxu1 %v252_v3 }
 0x108   :  { %464 = vmatpush3.bf16.msra.mxu1 %v252_v3 }
 0x109   :  { %465 = vmatprep.subr.bf16.mxu1 %v253_v2 }
 0x10c   :  { %466 = vmatpush3.bf16.msra.mxu1 %v253_v2 }
 0x10f   :  { %468 = vmatmul.mubr.msk.bf16.vlgmr.msra.gmra.mrb[0].mxu1 %vm288_vm0, %v487_v4 }
 0x1e2   :  { %v469_v9 = vpop.f32.mrb[0].mxu1 }
 0x1e3   :  { %v329_v10 = vpop.f32.mrb[1].mxu1  ;;  %v338_v11 = vadd.f32 %v469_v9, %v271_v7 }
 0x1e4   :  { %v330_v12 = vadd.f32 %v329_v10, %v261_v5  ;;  %v470_v13 = vpop.f32.mrb[2].mxu1 }
 0x1e5   :  { %v332_v15 = vpop.f32.mrb[3].mxu1  ;;  %v341_v17 = vadd.f32 %v470_v13, %v276_v8  ;;  %v346_v20 = vmax.f32 %v338_v11, 0.0 }
 0x1e6   :  { %v344_v16 = vmax.f32 %v330_v12, 0.0  ;;  %v333_v18 = vadd.f32 %v332_v15, %v266_v6 }
 0x1e7   :  { %v347_v23 = vmax.f32 %v341_v17, 0.0  ;;  %v374_v26 = vmul.f32 %v365_v25, %v346_v20 }
 0x1e8   :  { %v345_v21 = vmax.f32 %v333_v18, 0.0  ;;  %v372_v22 = vmul.f32 %v355_v14, %v344_v16 }
 0x1e9   :  { %v375_v29 = vmul.f32 %v370_v28, %v347_v23 }
 0x1ea   :  { %v373_v24 = vmul.f32 %v360_v19, %v345_v21 }
 0x1ec   :  { %v376_v27 = vadd.f32 %v373_v24, %v372_v22 }
 0x1ee   :  { %v377_v30 = vadd.f32 %v376_v27, %v374_v26 }
 0x1f0   :  { %v378_v32 = vadd.f32 %v377_v30, %v375_v29 }
 0x1f2   :  { %v379_v33 = vrot.slane %v378_v32, 4 }
 0x1f4   :  { %v380_v35 = vadd.f32 %v379_v33, %v378_v32 }
 0x1f6   :  { %v381_v36 = vrot.slane %v380_v35, 2 }
 0x1f8   :  { %v382_v38 = vadd.f32 %v381_v36, %v380_v35 }
 0x1fa   :  { %v383_v40 = vrot.slane %v382_v38, 1 }
 0x1fc   :  { %v384_v42 = vadd.f32 %v383_v40, %v382_v38 }
 0x1fe   :  { %v395_v43 = vadd.f32 %v394_v41, %v384_v42 }
 0x200   :  { %396 = vst [vmem:[%s634_s7] sm:$0x1] %v395_v43 }

</bundles_post_ra>
